<compile_context>
chip_gen: v5e
topology: v5e:2x2
jax: 0.10.0
libtpu: 0.0.40
codegen_flags: <defaults>
</compile_context>

<pallas_src>
import jax
import jax.numpy as jnp
from jax.experimental import pallas as pl
from jax.experimental.pallas import tpu as pltpu


def _mean_pool_kernel_f32(h_ref, m3_ref, inv_ref, o_ref):
    """Exact VPU path for float32 hidden states.

    h_ref:   (TB, TS, TH)  float32 hidden tile
    m3_ref:  (TB, TS, 1)   float32 mask tile (seq on sublanes -> cheap lane broadcast)
    inv_ref: (TB, 1)       float32 precomputed 1 / clamp(sum(mask), 1e-9)
    o_ref:   (TB, TH)      float32 output tile; VMEM-resident accumulator over seq
    """
    s_idx = pl.program_id(2)

    @pl.when(s_idx == 0)
    def _init():
        o_ref[...] = jnp.zeros_like(o_ref)

    # (TB, TS, TH) * (TB, TS, 1) -> sum over the seq (sublane) axis. Exact in f32.
    o_ref[...] += jnp.sum(h_ref[...] * m3_ref[...], axis=1)

    @pl.when(s_idx == pl.num_programs(2) - 1)
    def _finalize():
        o_ref[...] = o_ref[...] * inv_ref[...]


def _mean_pool_kernel_mxu(h_ref, m_ref, inv_ref, o_ref):
    """MXU path for bf16 (and other sub-f32) hidden states.

    h_ref:   (TB, TS, TH)  hidden tile (e.g. bfloat16)
    m_ref:   (TB, TS)      float32 mask tile (cast in-kernel; 0/1 exact in bf16)
    inv_ref: (TB, 1)       float32 reciprocal counts
    o_ref:   (TB, TH)      float32 output tile / accumulator
    """
    s_idx = pl.program_id(2)

    @pl.when(s_idx == 0)
    def _init():
        o_ref[...] = jnp.zeros_like(o_ref)

    h = h_ref[...]
    m = m_ref[...].astype(h.dtype)                     # tiny (TB, TS) cast
    # Batched (1, TS) x (TS, TH) contraction on the MXU, accumulate in f32.
    part = jnp.einsum("bqs,bsh->bqh", m[:, None, :], h,
                      preferred_element_type=jnp.float32)  # (TB, 1, TH)
    o_ref[...] += part[:, 0, :]

    @pl.when(s_idx == pl.num_programs(2) - 1)
    def _finalize():
        o_ref[...] = o_ref[...] * inv_ref[...]


def _vmem_limit_bytes():
    """Generation-aware scoped-VMEM limit: 64 MiB on v5e/v6e, ~48 MiB on v7x."""
    cap = None
    try:
        info = pltpu.get_tpu_info()
        cap = getattr(info, "vmem_capacity_bytes", None)
    except Exception:
        cap = None
    if not cap:
        cap = 64 * 1024 * 1024          # conservative (v7x per-core physical VMEM)
    return int(min(cap * 3 // 4, 64 * 1024 * 1024))


def _choose_tiles(B, S, H, itemsize, block_budget_bytes, f32_path):
    """Pick (tb, ts, th, pad_s). One (hidden + mask) block stays <= the budget so
    double-buffering fits comfortably under the scoped VMEM limit."""
    tb = B if B < 8 else 8              # mask/out sublane dim: full B or 8-aligned
    th = H if H <= 1024 else 1024       # lane-dense: full H or a 128-multiple

    # v7x megacore: guarantee >= 2 "parallel" grid points when H can be split
    # cleanly (no effect on single-TC v5e/v6e).
    if (pl.cdiv(B, tb) * pl.cdiv(H, th)) < 2 and H >= 256 and H % 256 == 0:
        th = H // 2                     # still a multiple of 128, divides H

    # Per-seq-row VMEM cost of one block (hidden + mask), per buffer.
    # f32 path: mask block is (tb, ts, 1) -> lane-padded to 128 (512 B per row).
    mask_row_bytes = 128 * 4 if f32_path else 4
    row_bytes = tb * (th * itemsize + mask_row_bytes)

    if S * row_bytes <= block_budget_bytes:
        return tb, S, th, 0             # whole seq axis in one block, no padding

    # Tile the seq axis: pad S to a multiple of 128, then pick the largest
    # 128-multiple divisor of the padded S that honors the budget.
    s_pad = pl.cdiv(S, 128) * 128
    cap = max((block_budget_bytes // row_bytes) // 128 * 128, 128)
    ts = 128
    cand = min(cap, s_pad)
    while cand >= 128:
        if s_pad % cand == 0:
            ts = cand
            break
        cand -= 128
    return tb, ts, th, s_pad - S


def mean_pooling_a(last_hidden_state, attention_mask, *, block_budget_bytes=None):
    """Pallas implementation of MeanPoolingA.forward.

    last_hidden_state: [B, S, H]  float32 or bfloat16
    attention_mask:    [B, S]     any numeric dtype (0/1 mask)
    returns:           [B, H]     float32
    block_budget_bytes: optional override of the per-block VMEM budget (testing).
    """
    B, S, H = last_hidden_state.shape
    assert attention_mask.shape == (B, S)

    h_dtype = last_hidden_state.dtype
    f32_path = h_dtype == jnp.float32
    itemsize = jnp.dtype(h_dtype).itemsize

    # Mask kept in float32 host-side (layout-safe for any tb and hidden dtype).
    mask_f32 = attention_mask.astype(jnp.float32)
    counts = jnp.sum(mask_f32, axis=1, keepdims=True)
    inv_counts = 1.0 / jnp.maximum(counts, 1e-9)          # (B, 1) float32

    vmem_limit = _vmem_limit_bytes()
    budget = (block_budget_bytes if block_budget_bytes
              else min(16 * 1024 * 1024, vmem_limit // 3))
    tb, ts, th, pad_s = _choose_tiles(B, S, H, itemsize, budget, f32_path)

    hidden = last_hidden_state
    if pad_s:
        # Zero-padded seq rows carry mask == 0, so they contribute exactly 0.
        hidden = jnp.pad(hidden, ((0, 0), (0, pad_s), (0, 0)))
        mask_f32 = jnp.pad(mask_f32, ((0, 0), (0, pad_s)))
    Sp = S + pad_s

    grid = (pl.cdiv(B, tb), pl.cdiv(H, th), Sp // ts)

    if f32_path:
        kernel = _mean_pool_kernel_f32
        mask_in = mask_f32[..., None]                       # (B, Sp, 1)
        mask_spec = pl.BlockSpec((tb, ts, 1), lambda i, j, k: (i, k, 0))
    else:
        kernel = _mean_pool_kernel_mxu
        mask_in = mask_f32                                  # (B, Sp)
        mask_spec = pl.BlockSpec((tb, ts), lambda i, j, k: (i, k))

    grid_spec = pltpu.PrefetchScalarGridSpec(
        num_scalar_prefetch=0,
        grid=grid,
        in_specs=[
            pl.BlockSpec((tb, ts, th), lambda i, j, k: (i, k, j)),
            mask_spec,
            pl.BlockSpec((tb, 1), lambda i, j, k: (i, 0)),
        ],
        out_specs=pl.BlockSpec((tb, th), lambda i, j, k: (i, j)),
    )

    return pl.pallas_call(
        kernel,
        out_shape=jax.ShapeDtypeStruct((B, H), jnp.float32),
        grid_spec=grid_spec,
        compiler_params=pltpu.CompilerParams(
            dimension_semantics=("parallel", "parallel", "arbitrary"),
            vmem_limit_bytes=vmem_limit,
        ),
    )(hidden, mask_in, inv_counts)


def _reference(last_hidden_state, attention_mask):
    m = attention_mask[..., None].astype(jnp.float32)
    h = last_hidden_state.astype(jnp.float32)
    s = jnp.sum(h * m, axis=1)
    d = jnp.maximum(jnp.sum(m, axis=1), 1e-9)
    return s / d


if __name__ == "__main__":
    key = jax.random.PRNGKey(0)
    k1, k2, k3, k4 = jax.random.split(key, 4)

    # 1) Small canonical shapes implied by the module: [B, S, H] + [B, S].
    B, S, H = 2, 8, 32
    hidden = jax.random.normal(k1, (B, S, H), dtype=jnp.float32)
    mask = (jax.random.uniform(k2, (B, S)) > 0.3).astype(jnp.int32)
    out = jax.block_until_ready(mean_pooling_a(hidden, mask))
    ref = _reference(hidden, mask)
    assert out.shape == (B, H) and out.dtype == jnp.float32
    assert jnp.allclose(out, ref, atol=1e-5, rtol=1e-5), "f32 mismatch vs reference"

    # 2) bf16 hidden states (MXU path, f32 accumulation).
    hidden_bf16 = hidden.astype(jnp.bfloat16)
    out_bf = jax.block_until_ready(mean_pooling_a(hidden_bf16, mask))
    assert jnp.allclose(out_bf, _reference(hidden_bf16, mask),
                        atol=1e-4, rtol=1e-4), "bf16 mismatch vs reference"

    # 3) Larger f32: exercises batch/hidden tiling (grid (2, 2, 1)).
    B2, S2, H2 = 16, 256, 2048
    hidden_big = jax.random.normal(k3, (B2, S2, H2), dtype=jnp.float32)
    mask_big = (jax.random.uniform(k4, (B2, S2)) > 0.3).astype(jnp.int32)
    out_big = jax.block_until_ready(mean_pooling_a(hidden_big, mask_big))
    assert jnp.allclose(out_big, _reference(hidden_big, mask_big),
                        atol=1e-4, rtol=1e-4), "tiled f32 mismatch vs reference"

    # 4) Non-128 seq length + forced small block budget: exercises seq zero-padding,
    #    the seq-axis grid reduction/accumulator, and the megacore hidden split.
    k5, k6 = jax.random.split(k3)
    B3, S3, H3 = 4, 200, 512
    hidden_odd = jax.random.normal(k5, (B3, S3, H3), dtype=jnp.float32)
    mask_odd = (jax.random.uniform(k6, (B3, S3)) > 0.3).astype(jnp.int32)
    out_odd = jax.block_until_ready(
        mean_pooling_a(hidden_odd, mask_odd, block_budget_bytes=256 * 1024))
    assert jnp.allclose(out_odd, _reference(hidden_odd, mask_odd),
                        atol=1e-4, rtol=1e-4), "padded f32 mismatch vs reference"

    out_odd_bf = jax.block_until_ready(
        mean_pooling_a(hidden_odd.astype(jnp.bfloat16), mask_odd,
                       block_budget_bytes=256 * 1024))
    assert jnp.allclose(out_odd_bf,
                        _reference(hidden_odd.astype(jnp.bfloat16), mask_odd),
                        atol=1e-3, rtol=1e-3), "padded bf16 mismatch vs reference"

    print("KERNEL_OK")
</pallas_src>

<mosaic_0001>
module attributes {stable_mosaic.version = 11 : i64} {
  func.func @_mean_pool_kernel_f32(%arg0: i32, %arg1: i32, %arg2: i32, %arg3: memref<2x8x32xf32, #tpu.memory_space<vmem>>, %arg4: memref<2x8x1xf32, #tpu.memory_space<vmem>>, %arg5: memref<2x1xf32, #tpu.memory_space<vmem>>, %arg6: memref<2x32xf32, #tpu.memory_space<vmem>>) attributes {dimension_semantics = [#tpu.dimension_semantics<parallel>, #tpu.dimension_semantics<parallel>, #tpu.dimension_semantics<arbitrary>], iteration_bounds = array<i64: 1, 1, 1>, scalar_prefetch = 0 : i64, scratch_operands = 0 : i64, tpu.core_type = #tpu.core_type<tc>, window_params = [{transform_indices = @transform_0, window_bounds = array<i64: 2, 8, 32>}, {transform_indices = @transform_1, window_bounds = array<i64: 2, 8, 1>}, {transform_indices = @transform_2, window_bounds = array<i64: 2, 1>}, {transform_indices = @transform_3, window_bounds = array<i64: 2, 32>}]} {
    %c0_i32 = arith.constant 0 : i32
    %0 = arith.cmpi eq, %arg2, %c0_i32 : i32
    %1 = arith.extui %0 : i1 to i32
    %c0_i32_0 = arith.constant 0 : i32
    %2 = arith.cmpi ne, %1, %c0_i32_0 : i32
    scf.if %2 {
      %cst_12 = arith.constant 0.000000e+00 : f32
      %14 = vector.broadcast %cst_12 : f32 to vector<2x32xf32>
      %c0_13 = arith.constant 0 : index
      %c0_14 = arith.constant 0 : index
      %15 = vector.load %arg6[%c0_13, %c0_14] : memref<2x32xf32, #tpu.memory_space<vmem>>, vector<2x32xf32>
      tpu.vector_store %arg6[%c0_13, %c0_14], %14 {strides = array<i32>} : memref<2x32xf32, #tpu.memory_space<vmem>>, vector<2x32xf32>,
    } else {
    }
    %c0 = arith.constant 0 : index
    %c0_1 = arith.constant 0 : index
    %3 = vector.load %arg6[%c0, %c0_1] : memref<2x32xf32, #tpu.memory_space<vmem>>, vector<2x32xf32>
    %c0_2 = arith.constant 0 : index
    %c0_3 = arith.constant 0 : index
    %c0_4 = arith.constant 0 : index
    %4 = vector.load %arg3[%c0_2, %c0_3, %c0_4] : memref<2x8x32xf32, #tpu.memory_space<vmem>>, vector<2x8x32xf32>
    %c0_5 = arith.constant 0 : index
    %c0_6 = arith.constant 0 : index
    %c0_7 = arith.constant 0 : index
    %5 = vector.load %arg4[%c0_5, %c0_6, %c0_7] : memref<2x8x1xf32, #tpu.memory_space<vmem>>, vector<2x8x1xf32>
    %6 = vector.broadcast %5 : vector<2x8x1xf32> to vector<2x8x32xf32>
    %7 = arith.mulf %4, %6 : vector<2x8x32xf32>
    %cst = arith.constant dense<0.000000e+00> : vector<2x32xf32>
    %8 = vector.multi_reduction <add>, %7, %cst [1] : vector<2x8x32xf32> to vector<2x32xf32>
    %9 = arith.addf %3, %8 : vector<2x32xf32>
    %c0_8 = arith.constant 0 : index
    %c0_9 = arith.constant 0 : index
    %10 = vector.load %arg6[%c0_8, %c0_9] : memref<2x32xf32, #tpu.memory_space<vmem>>, vector<2x32xf32>
    tpu.vector_store %arg6[%c0_8, %c0_9], %9 {strides = array<i32>} : memref<2x32xf32, #tpu.memory_space<vmem>>, vector<2x32xf32>,
    %c0_i32_10 = arith.constant 0 : i32
    %11 = arith.cmpi eq, %arg2, %c0_i32_10 : i32
    %12 = arith.extui %11 : i1 to i32
    %c0_i32_11 = arith.constant 0 : i32
    %13 = arith.cmpi ne, %12, %c0_i32_11 : i32
    scf.if %13 {
      %c0_12 = arith.constant 0 : index
      %c0_13 = arith.constant 0 : index
      %14 = vector.load %arg6[%c0_12, %c0_13] : memref<2x32xf32, #tpu.memory_space<vmem>>, vector<2x32xf32>
      %c0_14 = arith.constant 0 : index
      %c0_15 = arith.constant 0 : index
      %15 = vector.load %arg5[%c0_14, %c0_15] : memref<2x1xf32, #tpu.memory_space<vmem>>, vector<2x1xf32>
      %16 = vector.broadcast %15 : vector<2x1xf32> to vector<2x32xf32>
      %17 = arith.mulf %14, %16 : vector<2x32xf32>
      %c0_16 = arith.constant 0 : index
      %c0_17 = arith.constant 0 : index
      %18 = vector.load %arg6[%c0_16, %c0_17] : memref<2x32xf32, #tpu.memory_space<vmem>>, vector<2x32xf32>
      tpu.vector_store %arg6[%c0_16, %c0_17], %17 {strides = array<i32>} : memref<2x32xf32, #tpu.memory_space<vmem>>, vector<2x32xf32>,
    } else {
    }
    return
  }
  func.func @transform_0(%arg0: i32, %arg1: i32, %arg2: i32) -> (i32, i32, i32) {
    %c0_i32 = arith.constant 0 : i32
    return %arg0, %arg2, %arg1 : i32, i32, i32
  }
  func.func @transform_1(%arg0: i32, %arg1: i32, %arg2: i32) -> (i32, i32, i32) {
    %c0_i32 = arith.constant 0 : i32
    %c0_i32_0 = arith.constant 0 : i32
    return %arg0, %arg2, %c0_i32 : i32, i32, i32
  }
  func.func @transform_2(%arg0: i32, %arg1: i32, %arg2: i32) -> (i32, i32) {
    %c0_i32 = arith.constant 0 : i32
    %c0_i32_0 = arith.constant 0 : i32
    return %arg0, %c0_i32 : i32, i32
  }
  func.func @transform_3(%arg0: i32, %arg1: i32, %arg2: i32) -> (i32, i32) {
    %c0_i32 = arith.constant 0 : i32
    return %arg0, %arg1 : i32, i32
  }
}

</mosaic_0001>

<bundles_post_ra>
// kernel: tpu_custom_call.1
= control target key start
LH: loop header
LB: loop body
LE: loop exit
PB: predicated region body
PF: predicated region fallthrough
CT: control target
= control target key end

     0   :  { %v120_v2 = vmov 0   ;;  %s164_s0 = inlined_call_operand.vmem [shape: f32[2,8,32], index: 0, kind: input, shape index: {}]   ;;  %s165_s1 = inlined_call_operand.vmem [shape: f32[2,8,1], index: 1, kind: input, shape index: {}]   ;;  %s166_s2 = inlined_call_operand.vmem [shape: f32[2,1], index: 2, kind: input, shape index: {}]   ;;  %s167_s3 = inlined_call_operand.hbm [shape: f32[2,32], index: 3, kind: output, shape index: {}]  }
   0x1   :  { %v24_v0 = vld [vmem:[%s165_s1] sm:$0xff]  ;;  %92 = vset.pattern.permute.xlu0 %v120_v2  ;;  %93 = vset.pattern.permute.xlu1 %v120_v2 }
   0x2   :  { %v65_v1 = vld [vmem:[%s166_s2] sm:$0x3] }
   0x3   :  { %8 = vsyncpa [#allocation3], 0  ;;  %28 = vperm.xlu0 %92, %v24_v0   ;;  %68 = vperm.xlu1 %93, %v65_v1   ;;  %v25_v3 = vld [vmem:[%s165_s1 + $0x8] sm:$0xff]  ;;  %vm19_vm0 = vcmask 254976   ;;  %v121_v4 = vmov 0.0   ;;  %v22_v5 = vld [vmem:[%s164_s0] sm:$0xff] }
   0x4   :  { %20 = vst.msk [vmem:[#allocation2] sm:$0x3] %vm19_vm0, %v121_v4  ;;  %vm38_vm1 = vcmask 261120   ;;  %v23_v11 = vld [vmem:[%s164_s0 + $0x8] sm:$0xff]  ;;  %vm55_vm2 = vcmask 1041409   ;;  %s122_s0 = smov [#allocation2]  }
   0x5   :  { %s78_s1 = sshll.u32 %s122_s0, 4  ;;  %s80_s23 = sshll.u32 %s167_s3, 4  ;;  %s79_s1 = int_to_ptr.vmem [resolvable:$true] %s78_s1  ;;  %s81_s23 = int_to_ptr.hbm [resolvable:$true] %s80_s23 }
   0xb   :  { %33 = vperm.xlu0 %92, %v25_v3   ;;  %v21_v24 = vld [vmem:[#allocation2] sm:$0x3] }
  0x75   :  { %v29_v6 = vpop.permute.xlu0 %28  ;;  %v69_v28 = vpop.permute.xlu1 %68 }
  0x76   :  { %v36_v7 = vmul.f32 %v29_v6, %v22_v5 }
  0x78   :  { %v39_v8 = vsel %vm38_vm1, %v36_v7, 0.0 }
  0x79   :  { %v40_v9 = vrot.slane %v39_v8, 4 }
  0x7b   :  { %v41_v10 = vadd.f32 %v40_v9, %v39_v8 }
  0x7d   :  { %v34_v12 = vpop.permute.xlu0 %33  ;;  %v42_v14 = vrot.slane %v41_v10, 2 }
  0x7e   :  { %v37_v13 = vmul.f32 %v34_v12, %v23_v11 }
  0x7f   :  { %v43_v17 = vadd.f32 %v42_v14, %v41_v10 }
  0x80   :  { %v46_v15 = vsel %vm38_vm1, %v37_v13, 0.0 }
  0x81   :  { %v47_v16 = vrot.slane %v46_v15, 4  ;;  %v44_v20 = vrot.slane %v43_v17, 1 }
  0x83   :  { %v48_v18 = vadd.f32 %v47_v16, %v46_v15  ;;  %v45_v23 = vadd.f32 %v44_v20, %v43_v17 }
  0x85   :  { %v49_v19 = vrot.slane %v48_v18, 2 }
  0x87   :  { %v50_v21 = vadd.f32 %v49_v19, %v48_v18 }
  0x89   :  { %v51_v22 = vrot.slane %v50_v21, 1 }
  0x8b   :  { %v52_v25 = vadd.f32 %v51_v22, %v50_v21 }
  0x8d   :  { %v56_v26 = vsel %vm55_vm2, %v52_v25, %v45_v23 }
  0x8e   :  { %v58_v27 = vadd.f32 %v56_v26, %v21_v24 }
  0x90   :  { %60 = vst.msk [vmem:[#allocation2] sm:$0x3] %vm19_vm0, %v58_v27 }
  0x97   :  { %v64_v29 = vld [vmem:[#allocation2] sm:$0x3] }
  0x98   :  { %v71_v30 = vmul.f32 %v69_v28, %v64_v29 }
  0x9a   :  { %72 = vst.msk [vmem:[#allocation2] sm:$0x3] %vm19_vm0, %v71_v30 }
  0x9b   :  { %83 = dma.vmem_to_hbm [thread:$0]  %s79_s1, 32, %s81_s23, [#allocation3]  }
  0x9c   :  { %118 = dma.done.wait [#allocation3], 32  }
  0x9d   :  { %119 = vsyncadd [#allocation3], 4294967264 }
  0x9e   :  { %88 = vsyncpa [#allocation3], 1 }

</bundles_post_ra>
